<compile_context>
chip_gen: v7x
topology: tpu7x:2x2x1
jax: 0.10.0
libtpu: 0.0.40
codegen_flags: <defaults>
</compile_context>

<pallas_src>
import functools
import math

import jax
import jax.numpy as jnp
from jax.experimental import pallas as pl
from jax.experimental.pallas import tpu as pltpu


def _round_up(a: int, b: int) -> int:
    return (a + b - 1) // b * b


def _choose_lane_tile(B: int, tile_b: int) -> int:
    """Lane tile: multiple of 128, capped so the grid has >= 2 steps (v7x TCs)."""
    B128 = _round_up(max(int(B), 1), 128)
    if B128 < 256:
        return 128
    half = _round_up(B128 // 2, 128)  # cap tile at ~half the padded batch
    return max(128, min(_round_up(int(tile_b), 128), half))


def _barf_embed_kernel(frep_ref, wrep_ref, phase_ref, x_ref, o_ref, *, n_freqs):
    # frep/wrep/phase: (6N, 1) f32 — each freq/weight repeated 6x;
    #   phase = [0,0,0,pi/2,pi/2,pi/2]*N so sin(f*x + phase) covers both the
    #   sin and cos channels in ONE sublane-dense EUP pass.
    # x_ref: (3, TL) f32, batch on lanes.   o_ref: (3 + 6N, TL).
    x = x_ref[...]                                          # (3, TL), lane-dense
    # Replicate x along sublanes: (3, TL) -> (6N, TL).  Sublane concat only
    # (no lane-axis relayout); cheap copy/XLU work done once per tile.
    x_rep = jnp.concatenate([x] * (2 * n_freqs), axis=0)    # (6N, TL)
    z = frep_ref[...] * x_rep + phase_ref[...]              # lane-broadcast of (6N,1)
    emb = wrep_ref[...] * jnp.sin(z)                        # single dense EUP pass

    o_ref[0:3, :] = x.astype(o_ref.dtype)
    o_ref[3:, :] = emb.astype(o_ref.dtype)                  # one contiguous store


class BarfPosEmbedding:
    def __init__(self, max_logscale, N_freqs, epoch_start, epoch_end, logscale=True):
        self.N_freqs = int(N_freqs)
        self.epoch_start = epoch_start
        self.epoch_end = epoch_end
        if logscale:
            freqs = 2.0 ** jnp.linspace(0.0, max_logscale, N_freqs)
        else:
            freqs = jnp.linspace(1.0, 2.0 ** max_logscale, N_freqs)
        self.freqs = freqs.astype(jnp.float32)                        # (N,)
        # Pre-broadcast static params to the repeated (6N, 1) column vectors the
        # kernel consumes (no in-kernel broadcast_in_dim of freqs).
        self._freqs_rep = jnp.repeat(self.freqs, 6).reshape(-1, 1)    # (6N, 1)
        half_pi = jnp.float32(jnp.pi / 2.0)
        phase = jnp.tile(
            jnp.array([0.0, 0.0, 0.0, 1.0, 1.0, 1.0], jnp.float32) * half_pi,
            self.N_freqs,
        )
        self._phase_rep = phase.reshape(-1, 1)                        # (6N, 1)

    def _barf_weights(self, epoch):
        """Branch-free replica of the PyTorch barf_weight(freq, epoch)."""
        epoch = jnp.asarray(epoch, jnp.float32)
        nf = jnp.float32(self.N_freqs)
        in_ramp = (epoch > self.epoch_start) & (epoch <= self.epoch_end)
        alpha = jnp.where(
            in_ramp,
            nf / jnp.maximum(epoch, jnp.float32(1e-12)),  # guard unselected branch
            jnp.where(epoch > self.epoch_end, nf, jnp.float32(0.0)),
        )
        d = alpha - self.freqs
        w = jnp.where(
            alpha < self.freqs,
            jnp.float32(0.0),
            jnp.where(d < 1.0, (1.0 - jnp.cos(d * jnp.pi)) / 2.0, jnp.float32(1.0)),
        )
        return w.astype(jnp.float32)   # (N,)

    def __call__(self, x, epoch, *, tile_b=8192, out_dtype=None,
                 transposed_output=False):
        """x: (B, 3) -> (B, 3 + 6*N_freqs)   (matches the torch module).

        Performance path: pass transposed_output=True to get (3+6N, B) and skip
        the HBM round-trip of the output transpose, and out_dtype=jnp.bfloat16
        to halve output writeback, when the consumer tolerates it.
        """
        B, D_in = x.shape
        assert D_in == 3, "BarfPosEmbedding expects x of shape (B, 3)"
        out_dtype = jnp.dtype(x.dtype if out_dtype is None else out_dtype)
        D_out = D_in * (2 * self.N_freqs + 1)

        w_rep = jnp.repeat(self._barf_weights(epoch), 6).reshape(-1, 1)  # (6N, 1)

        tl = _choose_lane_tile(B, tile_b)
        Bp = _round_up(B, tl)

        # Input plumbing (minor vs. output traffic; XLA fuses convert+transpose+pad).
        # TODO(synk): accept x pre-transposed as (3, B) f32 to skip this entirely.
        x_t = jnp.transpose(x.astype(jnp.float32))          # (3, B)
        if Bp != B:
            x_t = jnp.pad(x_t, ((0, 0), (0, Bp - B)))       # tail pad; sliced off below

        kernel = functools.partial(_barf_embed_kernel, n_freqs=self.N_freqs)
        six_n = 6 * self.N_freqs
        cost = pl.CostEstimate(
            flops=3 * six_n * Bp,                           # f*x, +phase, *w
            transcendentals=six_n * Bp,                     # one sin per trig channel
            bytes_accessed=3 * 4 * Bp + D_out * out_dtype.itemsize * Bp,
        )

        out_t = pl.pallas_call(
            kernel,
            out_shape=jax.ShapeDtypeStruct((D_out, Bp), out_dtype),
            grid=(Bp // tl,),
            in_specs=[
                pl.BlockSpec((six_n, 1), lambda i: (0, 0)),   # f_rep
                pl.BlockSpec((six_n, 1), lambda i: (0, 0)),   # w_rep
                pl.BlockSpec((six_n, 1), lambda i: (0, 0)),   # phase
                pl.BlockSpec((D_in, tl), lambda i: (0, i)),   # x as (3, B)
            ],
            out_specs=pl.BlockSpec((D_out, tl), lambda i: (0, i)),
            compiler_params=pltpu.CompilerParams(
                dimension_semantics=("parallel",),
                # Per-tile footprint @ tl=8192: ~2 MiB double-buffered — well
                # under 32 MiB scoped limit and v7x's 64 MiB physical VMEM.
                vmem_limit_bytes=32 * 1024 * 1024,
            ),
            cost_estimate=cost,
        )(self._freqs_rep, w_rep, self._phase_rep, x_t)

        if Bp != B:
            out_t = out_t[:, :B]
        if transposed_output:
            return out_t                 # (D_out, B): downstream matmul consumes this
        return jnp.transpose(out_t)      # (B, D_out), matches torch.cat(..., -1)


# ----------------------------- self-test helpers ------------------------------

def _torch_barf_weight(N_freqs, epoch_start, epoch_end, freq, epoch):
    """Independent, literal Python transcription of the PyTorch barf_weight."""
    alpha = 0.0
    if epoch_start < epoch <= epoch_end:
        alpha = N_freqs / epoch
    elif epoch > epoch_end:
        alpha = N_freqs
    if alpha < freq:
        return 0.0
    if 0 <= alpha - freq < 1:
        return (1.0 - math.cos((alpha - freq) * math.pi)) / 2.0
    return 1.0


def _reference(emb, x, epoch):
    """Pure-JAX reference mirroring the PyTorch forward (independent weights)."""
    out = [x]
    for k in range(emb.N_freqs):
        f = float(emb.freqs[k])
        w = _torch_barf_weight(emb.N_freqs, emb.epoch_start, emb.epoch_end, f, float(epoch))
        out.append(w * jnp.sin(f * x))
        out.append(w * jnp.cos(f * x))
    return jnp.concatenate(out, axis=-1)


if __name__ == "__main__":
    key = jax.random.PRNGKey(0)
    N_freqs = 4
    emb = BarfPosEmbedding(
        max_logscale=3, N_freqs=N_freqs, epoch_start=1, epoch_end=10, logscale=True
    )
    D_out = 3 + 6 * N_freqs

    # Small case (B=8): exercises lane padding 8 -> 128, grid of 1.
    x = jax.random.normal(key, (8, 3), dtype=jnp.float32)
    for epoch in (0.5, 1.5, 5.0, 20.0):  # below ramp / partial weights / zeroed / saturated
        out = jax.block_until_ready(emb(x, epoch))
        assert out.shape == (8, D_out), out.shape
        ref = _reference(emb, x, epoch)
        # cos(z)=sin(z+pi/2) fusion -> allow a few-ulp tolerance vs. direct cos.
        assert jnp.allclose(out, ref, atol=1e-4, rtol=1e-4), f"mismatch @ epoch={epoch}"

    # Ragged, multi-tile case (B=300): tile clamps to 256 -> grid of 2 (both v7x TCs).
    x2 = jax.random.normal(jax.random.PRNGKey(1), (300, 3), dtype=jnp.float32)
    ref2 = _reference(emb, x2, 1.5)
    out2 = jax.block_until_ready(emb(x2, 1.5))
    assert out2.shape == (300, D_out), out2.shape
    assert jnp.allclose(out2, ref2, atol=1e-4, rtol=1e-4), "mismatch (multi-tile)"

    # Recommended performance path: transposed (D_out, B) output + bf16 writeback.
    out3 = jax.block_until_ready(
        emb(x2, 1.5, out_dtype=jnp.bfloat16, transposed_output=True)
    )
    assert out3.shape == (D_out, 300), out3.shape
    assert jnp.allclose(out3.astype(jnp.float32), jnp.transpose(ref2),
                        atol=5e-2, rtol=5e-2), "mismatch (bf16 / transposed)"

    print("KERNEL_OK")
</pallas_src>

<mosaic_0001>
module attributes {stable_mosaic.version = 11 : i64} {
  func.func @_barf_embed_kernel(%arg0: i32, %arg1: memref<24x1xf32, #tpu.memory_space<vmem>>, %arg2: memref<24x1xf32, #tpu.memory_space<vmem>>, %arg3: memref<24x1xf32, #tpu.memory_space<vmem>>, %arg4: memref<3x128xf32, #tpu.memory_space<vmem>>, %arg5: memref<27x128xf32, #tpu.memory_space<vmem>>) attributes {dimension_semantics = [#tpu.dimension_semantics<parallel>], iteration_bounds = array<i64: 1>, scalar_prefetch = 0 : i64, scratch_operands = 0 : i64, tpu.core_type = #tpu.core_type<tc>, window_params = [{pipeline_mode = #tpu.pipeline_mode<synchronous>, transform_indices = @transform_0, window_bounds = array<i64: 24, 1>}, {pipeline_mode = #tpu.pipeline_mode<synchronous>, transform_indices = @transform_1, window_bounds = array<i64: 24, 1>}, {pipeline_mode = #tpu.pipeline_mode<synchronous>, transform_indices = @transform_2, window_bounds = array<i64: 24, 1>}, {transform_indices = @transform_3, window_bounds = array<i64: 3, 128>}, {transform_indices = @transform_4, window_bounds = array<i64: 27, 128>}]} {
    %c0 = arith.constant 0 : index
    %c0_0 = arith.constant 0 : index
    %0 = vector.load %arg4[%c0, %c0_0] : memref<3x128xf32, #tpu.memory_space<vmem>>, vector<3x128xf32>
    %1 = tpu.concatenate %0, %0, %0, %0, %0, %0, %0, %0 in 0 : vector<3x128xf32>, vector<3x128xf32>, vector<3x128xf32>, vector<3x128xf32>, vector<3x128xf32>, vector<3x128xf32>, vector<3x128xf32>, vector<3x128xf32> -> vector<24x128xf32>
    %c0_1 = arith.constant 0 : index
    %c0_2 = arith.constant 0 : index
    %2 = vector.load %arg1[%c0_1, %c0_2] : memref<24x1xf32, #tpu.memory_space<vmem>>, vector<24x1xf32>
    %3 = vector.broadcast %2 : vector<24x1xf32> to vector<24x128xf32>
    %4 = arith.mulf %3, %1 : vector<24x128xf32>
    %c0_3 = arith.constant 0 : index
    %c0_4 = arith.constant 0 : index
    %5 = vector.load %arg3[%c0_3, %c0_4] : memref<24x1xf32, #tpu.memory_space<vmem>>, vector<24x1xf32>
    %6 = vector.broadcast %5 : vector<24x1xf32> to vector<24x128xf32>
    %7 = arith.addf %4, %6 : vector<24x128xf32>
    %c0_5 = arith.constant 0 : index
    %c0_6 = arith.constant 0 : index
    %8 = vector.load %arg2[%c0_5, %c0_6] : memref<24x1xf32, #tpu.memory_space<vmem>>, vector<24x1xf32>
    %9 = math.sin %7 : vector<24x128xf32>
    %10 = vector.broadcast %8 : vector<24x1xf32> to vector<24x128xf32>
    %11 = arith.mulf %10, %9 : vector<24x128xf32>
    %c0_7 = arith.constant 0 : index
    %c0_8 = arith.constant 0 : index
    %12 = vector.load %arg5[%c0_7, %c0_8] : memref<27x128xf32, #tpu.memory_space<vmem>>, vector<3x128xf32>
    tpu.vector_store %arg5[%c0_7, %c0_8], %0 {strides = array<i32>} : memref<27x128xf32, #tpu.memory_space<vmem>>, vector<3x128xf32>,
    %c3 = arith.constant 3 : index
    %c0_9 = arith.constant 0 : index
    %13 = vector.load %arg5[%c3, %c0_9] : memref<27x128xf32, #tpu.memory_space<vmem>>, vector<24x128xf32>
    tpu.vector_store %arg5[%c3, %c0_9], %11 {strides = array<i32>} : memref<27x128xf32, #tpu.memory_space<vmem>>, vector<24x128xf32>,
    return
  }
  func.func @transform_0(%arg0: i32) -> (i32, i32) {
    %c0_i32 = arith.constant 0 : i32
    %c0_i32_0 = arith.constant 0 : i32
    %c0_i32_1 = arith.constant 0 : i32
    return %c0_i32, %c0_i32_0 : i32, i32
  }
  func.func @transform_1(%arg0: i32) -> (i32, i32) {
    %c0_i32 = arith.constant 0 : i32
    %c0_i32_0 = arith.constant 0 : i32
    %c0_i32_1 = arith.constant 0 : i32
    return %c0_i32, %c0_i32_0 : i32, i32
  }
  func.func @transform_2(%arg0: i32) -> (i32, i32) {
    %c0_i32 = arith.constant 0 : i32
    %c0_i32_0 = arith.constant 0 : i32
    %c0_i32_1 = arith.constant 0 : i32
    return %c0_i32, %c0_i32_0 : i32, i32
  }
  func.func @transform_3(%arg0: i32) -> (i32, i32) {
    %c0_i32 = arith.constant 0 : i32
    %c0_i32_0 = arith.constant 0 : i32
    return %c0_i32, %arg0 : i32, i32
  }
  func.func @transform_4(%arg0: i32) -> (i32, i32) {
    %c0_i32 = arith.constant 0 : i32
    %c0_i32_0 = arith.constant 0 : i32
    return %c0_i32, %arg0 : i32, i32
  }
}

</mosaic_0001>

<bundles_post_ra>
// kernel: tpu_custom_call.1
= control target key start
LH: loop header
LB: loop body
LE: loop exit
PB: predicated region body
PF: predicated region fallthrough
CT: control target
= control target key end

     0   :  { %v515_v2 = vmov 0   ;;  %s828_s0 = inlined_call_operand.vmem [shape: f32[24,1], index: 0, kind: input, shape index: {}]   ;;  %s829_s1 = inlined_call_operand.vmem [shape: f32[24,1], index: 1, kind: input, shape index: {}]   ;;  %s830_s2 = inlined_call_operand.vmem [shape: f32[24,1], index: 2, kind: input, shape index: {}]   ;;  %s831_s3 = inlined_call_operand.vmem [shape: f32[3,128], index: 3, kind: input, shape index: {}]   ;;  %s832_s4 = inlined_call_operand.hbm [shape: f32[27,128], index: 4, kind: output, shape index: {}]  }
   0x1   :  { %v50_v0 = vld [vmem:[%s828_s0 + $0x10] sm:$0xff]  ;;  %v48_v1 = vld [vmem:[%s828_s0] sm:$0xff]  ;;  %478 = vset.pattern.permute.xlu1 %v515_v2  ;;  %477 = vset.pattern.permute.xlu0 %v515_v2  ;;  %v49_v4 = vld [vmem:[%s828_s0 + $0x8] sm:$0xff] }
   0x2   :  { %63 = vperm.xlu1 %478, %v50_v0   ;;  %53 = vperm.xlu0 %477, %v48_v1   ;;  %v69_v3 = vld [vmem:[%s830_s2] sm:$0xff] }
   0x3   :  { %v18_v5 = vld [vmem:[%s831_s3] sm:$0x7] }
   0x4   :  { %423 = vst [vmem:[#allocation2] sm:$0x7] %v18_v5 }
   0x5   :  { %9 = vsyncpa [#allocation3], 0  ;;  %v71_v6 = vld [vmem:[%s830_s2 + $0x10] sm:$0xff]  ;;  %v70_v7 = vld [vmem:[%s830_s2 + $0x8] sm:$0xff]  ;;  %v20_v11 = vrot.slane %v18_v5, 5  ;;  %vm34_vm0 = vcmask 1042432  }
   0x6   :  { %74 = vperm.xlu1 %478, %v69_v3   ;;  %58 = vperm.xlu0 %477, %v49_v4   ;;  %v91_v8 = vld [vmem:[%s829_s1 + $0x8] sm:$0xff]  ;;  %v90_v9 = vld [vmem:[%s829_s1] sm:$0xff]  ;;  %v92_v10 = vld [vmem:[%s829_s1 + $0x10] sm:$0xff]  ;;  %v24_v12 = vrot.slane %v18_v5, 7  ;;  %vm38_vm1 = vcmask 1040384   ;;  %v22_v13 = vrot.slane %v18_v5, 2 }
   0x7   :  { %vm36_vm2 = vcmask 1045504   ;;  %v28_v14 = vrot.slane %v18_v5, 1  ;;  %v30_v15 = vrot.slane %v18_v5, 6  ;;  %v35_v16 = vsel %vm34_vm0, %v18_v5, %v20_v11  ;;  %s522_s1 = smov [#allocation2]  }
   0x8   :  { %v26_v17 = vrot.slane %v18_v5, 4  ;;  %vm44_vm3 = vcmask 1041408   ;;  %v39_v18 = vsel %vm38_vm1, %v22_v13, %v24_v12  ;;  %vm40_vm4 = vcmask 1043456   ;;  %s432_s2 = sshll.u32 %s522_s1, 4  ;;  %s433_s2 = int_to_ptr.vmem [resolvable:$true] %s432_s2 }
   0x9   :  { %v32_v20 = vrot.slane %v18_v5, 3  ;;  %v37_v22 = vsel %vm36_vm2, %v35_v16, %v22_v13  ;;  %v45_v23 = vsel %vm44_vm3, %v28_v14, %v30_v15  ;;  %vm46_vm5 = vcmask 1044480   ;;  %s491_s7 = scalar_lea.vmem %s433_s2, 512  ;;  %p496_p1 = scmp.lt.s32.totalorder %s433_s2, %s433_s2 }
   0xa   :  { %84 = vperm.xlu1 %478, %v71_v6   ;;  %79 = vperm.xlu0 %477, %v70_v7   ;;  %v41_v24 = vsel %vm40_vm4, %v39_v18, %v26_v17  ;;  %vm42_vm6 = vcmask 1046528   ;;  %v516_v61 = vmov 920167782   ;;  %v517_v1 = vmov 1326507024   ;;  %p492_p0 = scmp.ne.s32.totalorder %s433_s2, %s491_s7  ;;  %p497_p2 = scmp.lt.s32.totalorder %s491_s7, %s491_s7 }
   0xb   :  { %v47_v26 = vsel %vm46_vm5, %v45_v23, %v32_v20  ;;  %v43_v29 = vsel %vm42_vm6, %v41_v24, %v28_v14  ;;  %v519_v12 = vmov 683565275   ;;  %v520_v17 = vmov 2475754826  }
   0xc   :  { %p498_p3 = por %p497_p2, %p496_p1 }
   0xe   :  { %412 = vperm.xlu1 %478, %v91_v8   ;;  %407 = vperm.xlu0 %477, %v90_v9   ;;  %v518_v9 = vmov 2102212464   ;;  %p499_p4 = pnand %p498_p3, %p492_p0 }
  0x12   :  { %417 = vperm.xlu0 %477, %v92_v10  }
  0x81   :  { %v64_v19 = vpop.permute.xlu1 %63  ;;  %v54_v21 = vpop.permute.xlu0 %53 }
  0x82   :  { %v66_v25 = vmul.f32 %v54_v21, %v37_v22  ;;  %v68_v31 = vmul.f32 %v64_v19, %v47_v26 }
  0x85   :  { %v75_v27 = vpop.permute.xlu1 %74  ;;  %v59_v28 = vpop.permute.xlu0 %58 }
  0x86   :  { %v580_v30 = vadd.f32 %v75_v27, %v66_v25  ;;  %v67_v33 = vmul.f32 %v59_v28, %v43_v29 }
  0x88   :  { %v96_v32 = vand.u32 2139095040, %v580_v30  ;;  %v93_v36 = vand.u32 2147483647, %v580_v30 }
  0x89   :  { %v85_v34 = vpop.permute.xlu1 %84  ;;  %v80_v35 = vpop.permute.xlu0 %79 }
  0x8a   :  { %v97_v37 = vshrl.u32 %v96_v32, 23  ;;  %v584_v38 = vadd.f32 %v85_v34, %v68_v31  ;;  %v586_v39 = vadd.f32 %v80_v35, %v67_v33  ;;  %v100_v44 = vand.u32 8388607, %v93_v36 }
  0x8c   :  { %v443_v40 = vadd.s32 4294967169, %v97_v37  ;;  %v304_v41 = vand.u32 2139095040, %v584_v38  ;;  %v200_v42 = vand.u32 2139095040, %v586_v39  ;;  %v197_v43 = vand.u32 2147483647, %v586_v39 }
  0x8d   :  { %v301_v49 = vand.u32 2147483647, %v584_v38  ;;  %v101_v53 = vor.u32 8388608, %v100_v44 }
  0x8e   :  { %v103_v45 = vadd.s32 1, %v443_v40  ;;  %v305_v46 = vshrl.u32 %v304_v41, 23  ;;  %v201_v47 = vshrl.u32 %v200_v42, 23  ;;  %v204_v48 = vand.u32 8388607, %v197_v43 }
  0x8f   :  { %v600_v58 = vand.u32 8388607, %v301_v49  ;;  %v608_v63 = vshll.u32 %v101_v53, 8  ;;  %v521_v41 = vmov 2131351028  }
  0x90   :  { %vm104_vm7 = vcmp.gt.s32.totalorder %v103_v45, 0  ;;  %v451_v50 = vadd.s32 4294967169, %v305_v46  ;;  %v447_v52 = vadd.s32 4294967169, %v201_v47  ;;  %v205_v57 = vor.u32 8388608, %v204_v48 }
  0x91   :  { %v105_v51 = vsel %vm104_vm7, %v103_v45, 0  ;;  %v309_v8 = vor.u32 8388608, %v600_v58 }
  0x92   :  { %v596_v54 = vand.u32 31, %v105_v51  ;;  %v311_v55 = vadd.s32 1, %v451_v50  ;;  %v207_v56 = vadd.s32 1, %v447_v52  ;;  %v602_v59 = vshrl.u32 %v105_v51, 5 }
  0x93   :  { %v614_v7 = vshll.u32 %v205_v57, 8 }
  0x94   :  { %v605_v60 = vsub.s32 32, %v596_v54  ;;  %v122_v62 = vshll.u32 %v516_v61, %v596_v54  ;;  %vm312_vm8 = vcmp.gt.s32.totalorder %v311_v55, 0  ;;  %vm208_vm9 = vcmp.gt.s32.totalorder %v207_v56, 0 }
  0x95   :  { %v313_v3 = vsel %vm312_vm8, %v311_v55, 0  ;;  %v209_v4 = vsel %vm208_vm9, %v207_v56, 0  ;;  %v119_v10 = vshll.u32 %v518_v9, %v596_v54  ;;  %vm128_vm10 = vcmp.lt.s32.totalorder %v602_v59, 4 }
  0x96   :  { %v120_v0 = vshrl.u32 %v516_v61, %v605_v60  ;;  %v123_v2 = vshrl.u32 %v517_v1, %v605_v60  ;;  %v612_v5 = vand.u32 31, %v313_v3  ;;  %v211_v6 = vand.u32 31, %v209_v4 }
  0x97   :  { %v110_v13 = vshll.u32 %v519_v12, %v596_v54  ;;  %v622_v14 = vshrl.u32 %v313_v3, 5  ;;  %v210_v16 = vshrl.u32 %v209_v4, 5  ;;  %v113_v18 = vshll.u32 %v520_v17, %v596_v54 }
  0x98   :  { %v124_v11 = vor.u32 %v123_v2, %v122_v62  ;;  %v625_v15 = vsub.s32 32, %v612_v5  ;;  %v121_v19 = vor.u32 %v120_v0, %v119_v10  ;;  %v212_v20 = vsub.s32 32, %v211_v6 }
  0x99   :  { %v109_v21 = vshrl.u32 %v519_v12, %v605_v60  ;;  %v111_v22 = vshrl.u32 %v520_v17, %v605_v60  ;;  %v327_v24 = vshll.u32 %v518_v9, %v612_v5  ;;  %v638_v25 = vshll.u32 %v516_v61, %v612_v5 }
  0x9a   :  { %v138_v23 = vsel %vm128_vm10, %v124_v11, 1326507024  ;;  %v223_v26 = vshll.u32 %v518_v9, %v211_v6  ;;  %v328_v27 = vshrl.u32 %v516_v61, %v625_v15  ;;  %v224_v28 = vshrl.u32 %v516_v61, %v212_v20 }
  0x9b   :  { %v226_v29 = vshll.u32 %v516_v61, %v211_v6  ;;  %v227_v31 = vshrl.u32 %v517_v1, %v212_v20  ;;  %v643_v32 = vshrl.u32 %v517_v1, %v625_v15  ;;  %vm232_vm11 = vcmp.lt.s32.totalorder %v210_v16, 4 }
  0x9c   :  { %v214_v33 = vshll.u32 %v519_v12, %v211_v6  ;;  %v215_v34 = vshrl.u32 %v520_v17, %v212_v20  ;;  %v225_v35 = vor.u32 %v224_v28, %v223_v26  ;;  %v217_v40 = vshll.u32 %v520_v17, %v211_v6 }
  0x9d   :  { %v228_v37 = vor.u32 %v227_v31, %v226_v29  ;;  %v218_v42 = vshrl.u32 %v521_v41, %v212_v20  ;;  %v213_v44 = vshrl.u32 %v519_v12, %v212_v20  ;;  %v220_v46 = vshll.u32 %v521_v41, %v211_v6 }
  0x9e   :  { %v216_v45 = vor.u32 %v215_v34, %v214_v33  ;;  %v221_v47 = vshrl.u32 %v518_v9, %v212_v20  ;;  %v238_v48 = vsel %vm232_vm11, %v225_v35, 920167782  ;;  %vm229_vm12 = vcmp.lt.s32.totalorder %v210_v16, 1 }
  0x9f   :  { %v242_v50 = vsel %vm232_vm11, %v228_v37, 1326507024  ;;  %v219_v51 = vor.u32 %v218_v42, %v217_v40  ;;  %vm230_vm13 = vcmp.lt.s32.totalorder %v210_v16, 2  ;;  %vm231_vm14 = vcmp.lt.s32.totalorder %v210_v16, 3 }
  0xa0   :  { %v222_v52 = vor.u32 %v221_v47, %v220_v46  ;;  %v233_v53 = vsel %vm229_vm12, %v213_v44, %v216_v45  ;;  %v243_v56 = vsel %vm231_vm14, %v225_v35, %v242_v50  ;;  %v112_v57 = vor.u32 %v111_v22, %v110_v13 }
  0xa1   :  { %v237_v55 = vsel %vm229_vm12, %v216_v45, %v219_v51  ;;  %v114_v61 = vshrl.u32 %v521_v41, %v605_v60  ;;  %v116_v2 = vshll.u32 %v521_v41, %v596_v54  ;;  %vm336_vm15 = vcmp.lt.s32.totalorder %v622_v14, 4 }
  0xa2   :  { %v234_v62 = vsel %vm232_vm11, %v222_v52, 2102212464  ;;  %v239_v0 = vsel %vm231_vm14, %v222_v52, %v238_v48  ;;  %v241_v1 = vsel %vm229_vm12, %v219_v51, %v222_v52  ;;  %v117_v22 = vshrl.u32 %v518_v9, %v605_v60 }
  0xa3   :  { %v235_v3 = vsel %vm231_vm14, %v219_v51, %v234_v62  ;;  %v240_v4 = vsel %vm230_vm13, %v237_v55, %v239_v0  ;;  %v244_v6 = vsel %vm230_vm13, %v241_v1, %v243_v56  ;;  %v115_v10 = vor.u32 %v114_v61, %v113_v18 }
  0xa4   :  { %v236_v11 = vsel %vm230_vm13, %v233_v53, %v235_v3  ;;  %v664_v13 = vmul.u32.u64.low %v614_v7, %v244_v6  ;;  %v665_v20 = vmul.u32.u64.high %v614_v7, %v244_v6, %v664_v13  ;;  %v134_v54 = vsel %vm128_vm10, %v121_v19, 920167782 }
  0xa5   :  { %v329_v26 = vor.u32 %v328_v27, %v327_v24  ;;  %v672_v28 = vmul.u32.u64.low %v614_v7, %v240_v4  ;;  %v673_v29 = vmul.u32.u64.high %v614_v7, %v240_v4, %v672_v28  ;;  %v332_v16 = vor.u32 %v643_v32, %v638_v25 }
  0xa6   :  { %v118_v18 = vor.u32 %v117_v22, %v116_v2  ;;  %vm125_vm0 = vcmp.lt.s32.totalorder %v602_v59, 1  ;;  %vm127_vm1 = vcmp.lt.s32.totalorder %v602_v59, 3  ;;  %v252_v31 = vmul.u32 %v614_v7, %v236_v11 }
  0xa7   :  { %vm126_vm2 = vcmp.lt.s32.totalorder %v602_v59, 2  ;;  %v133_v60 = vsel %vm125_vm0, %v112_v57, %v115_v10  ;;  %v139_v33 = vsel %vm127_vm1, %v121_v19, %v138_v23  ;;  %vm254_vm3 = vc.u32 %v665_v20, %v672_v28 }
  0xa8   :  { %v129_v24 = vsel %vm125_vm0, %v109_v21, %v112_v57  ;;  %v130_v27 = vsel %vm128_vm10, %v118_v18, 2102212464  ;;  %v135_v34 = vsel %vm127_vm1, %v118_v18, %v134_v54  ;;  %v255_v25 = vadd.s32 1, %v673_v29 }
  0xa9   :  { %v131_v32 = vsel %vm127_vm1, %v115_v10, %v130_v27  ;;  %v136_v35 = vsel %vm126_vm2, %v133_v60, %v135_v34  ;;  %v137_v37 = vsel %vm125_vm0, %v115_v10, %v118_v18  ;;  %v318_v19 = vshll.u32 %v519_v12, %v612_v5 }
  0xaa   :  { %v140_v40 = vsel %vm126_vm2, %v137_v37, %v139_v33  ;;  %v688_v7 = vmul.u32.u64.low %v608_v63, %v136_v35  ;;  %v689_v42 = vmul.u32.u64.high %v608_v63, %v136_v35, %v688_v7  ;;  %v256_v21 = vsel %vm254_vm3, %v255_v25, %v673_v29 }
  0xab   :  { %v132_v23 = vsel %vm126_vm2, %v129_v24, %v131_v32  ;;  %v696_v59 = vmul.u32.u64.low %v608_v63, %v140_v40  ;;  %v697_v44 = vmul.u32.u64.high %v608_v63, %v140_v40, %v696_v59  ;;  %v257_v45 = vadd.s32 %v256_v21, %v252_v31 }
  0xac   :  { %v319_v46 = vshrl.u32 %v520_v17, %v625_v15  ;;  %v321_v47 = vshll.u32 %v520_v17, %v612_v5  ;;  %v322_v48 = vshrl.u32 %v521_v41, %v625_v15  ;;  %v342_v50 = vsel %vm336_vm15, %v329_v26, 920167782 }
  0xad   :  { %v346_v51 = vsel %vm336_vm15, %v332_v16, 1326507024  ;;  %v324_v52 = vshll.u32 %v521_v41, %v612_v5  ;;  %v325_v53 = vshrl.u32 %v518_v9, %v625_v15  ;;  %v258_v55 = vadd.s32 536870912, %v257_v45 }
  0xae   :  { %v151_v56 = vadd.s32 1, %v689_v42  ;;  %v320_v57 = vor.u32 %v319_v46, %v318_v19  ;;  %v323_v17 = vor.u32 %v322_v48, %v321_v47  ;;  %v148_v61 = vmul.u32 %v608_v63, %v132_v23 }
  0xaf   :  { %vm150_vm4 = vc.u32 %v697_v44, %v688_v7  ;;  %v326_v62 = vor.u32 %v325_v53, %v324_v52  ;;  %vm333_vm5 = vcmp.lt.s32.totalorder %v622_v14, 1  ;;  %v718_v0 = vshrl.u32 %v258_v55, 30 }
  0xb0   :  { %v152_v5 = vsel %vm150_vm4, %v151_v56, %v689_v42  ;;  %vm335_vm6 = vcmp.lt.s32.totalorder %v622_v14, 3  ;;  %v341_v9 = vsel %vm333_vm5, %v320_v57, %v323_v17  ;;  %v317_v3 = vshrl.u32 %v519_v12, %v625_v15 }
  0xb1   :  { %v153_v41 = vadd.s32 %v152_v5, %v148_v61  ;;  %v343_v1 = vsel %vm335_vm6, %v326_v62, %v342_v50  ;;  %v345_v63 = vsel %vm333_vm5, %v323_v17, %v326_v62  ;;  %v260_v2 = vshll.u32 %v718_v0, 30 }
  0xb2   :  { %vm334_vm7 = vcmp.lt.s32.totalorder %v622_v14, 2  ;;  %v338_v4 = vsel %vm336_vm15, %v326_v62, 2102212464  ;;  %v347_v11 = vsel %vm335_vm6, %v329_v26, %v346_v51  ;;  %v349_v13 = vshll.u32 %v309_v8, 8 }
  0xb3   :  { %v154_v6 = vadd.s32 536870912, %v153_v41  ;;  %v344_v10 = vsel %vm334_vm7, %v341_v9, %v343_v1  ;;  %v261_v22 = vsub.s32 %v257_v45, %v260_v2  ;;  %v348_v54 = vsel %vm334_vm7, %v345_v63, %v347_v11 }
  0xb4   :  { %v337_v15 = vsel %vm333_vm5, %v317_v3, %v320_v57  ;;  %v746_v29 = vmul.u32.u64.low %v349_v13, %v348_v54  ;;  %v747_v16 = vmul.u32.u64.high %v349_v13, %v348_v54, %v746_v29  ;;  %v339_v31 = vsel %vm335_vm6, %v323_v17, %v338_v4 }
  0xb5   :  { %v742_v12 = vshrl.u32 %v154_v6, 30  ;;  %v263_v18 = vsub.s32 0, %v261_v22  ;;  %v751_v26 = vmul.u32.u64.low %v349_v13, %v344_v10  ;;  %v752_v60 = vmul.u32.u64.high %v349_v13, %v344_v10, %v751_v26 }
  0xb6   :  { %v340_v24 = vsel %vm334_vm7, %v337_v15, %v339_v31  ;;  %v253_v14 = vadd.s32 %v672_v28, %v665_v20  ;;  %v149_v56 = vadd.s32 %v688_v7, %v697_v44  ;;  %v283_v63 = vsub.s32 4, %v718_v0 }
  0xb7   :  { %v156_v58 = vshll.u32 %v742_v12, 30  ;;  %v448_v8 = vmin.u32 %v263_v18, %v261_v22  ;;  %vm358_vm8 = vc.u32 %v747_v16, %v751_v26  ;;  %v359_v25 = vadd.s32 1, %v752_v60 }
  0xb8   :  { %v356_v35 = vmul.u32 %v349_v13, %v340_v24  ;;  %vm199_vm11 = vcmp.lt.s32.totalorder %v586_v39, 0  ;;  %v179_v54 = vsub.s32 4, %v742_v12  ;;  %vm775_vm12 = vcmp.le.f32.partialorder %v197_v43, 0.7853982 }
  0xb9   :  { %v157_v33 = vsub.s32 %v153_v41, %v156_v58  ;;  %v265_v27 = vclz %v448_v8  ;;  %v360_v40 = vsel %vm358_vm8, %v359_v25, %v752_v60  ;;  %v284_v11 = vsel %vm199_vm11, %v283_v63, %v718_v0 }
  0xba   :  { %v361_v42 = vadd.s32 %v360_v40, %v356_v35  ;;  %vm95_vm13 = vcmp.lt.s32.totalorder %v580_v30, 0  ;;  %v286_v0 = vsel %vm775_vm12, 0, %v284_v11  ;;  %vm788_vm15 = vcmp.le.f32.partialorder %v93_v36, 0.7853982 }
  0xbb   :  { %v159_v34 = vsub.s32 0, %v157_v33  ;;  %v449_v32 = vadd.s32 4294967294, %v265_v27  ;;  %v180_v43 = vsel %vm95_vm13, %v179_v54, %v742_v12  ;;  %v290_v35 = vadd.s32 3, %v286_v0 }
  0xbc   :  { %v362_v46 = vadd.s32 536870912, %v361_v42  ;;  %v182_v12 = vsel %vm788_vm15, 0, %v180_v43  ;;  %vm303_vm3 = vcmp.lt.s32.totalorder %v584_v38, 0  ;;  %vm289_vm4 = vweird.f32 %v586_v39 }
  0xbd   :  { %v444_v37 = vmin.u32 %v159_v34, %v157_v33  ;;  %vm450_vm9 = vcmp.lt.s32.totalorder %v449_v32, 0  ;;  %v357_v34 = vadd.s32 %v751_v26, %v747_v16  ;;  %vm804_vm6 = vcmp.le.f32.partialorder %v301_v49, 0.7853982 }
  0xbe   :  { %v268_v19 = vsel %vm450_vm9, 0, %v449_v32  ;;  %v764_v51 = vshrl.u32 %v362_v46, 30  ;;  %vm185_vm9 = vweird.f32 %v580_v30 }
  0xbf   :  { %v161_v21 = vclz %v444_v37  ;;  %v269_v23 = vsub.s32 32, %v268_v19  ;;  %v273_v59 = vsub.s32 4294967266, %v268_v19  ;;  %v270_v47 = vshll.u32 %v261_v22, %v268_v19 }
  0xc0   :  { %v364_v20 = vshll.u32 %v764_v51, 30 }
  0xc1   :  { %v445_v45 = vadd.s32 4294967294, %v161_v21  ;;  %v271_v48 = vshrl.u32 %v253_v14, %v269_v23  ;;  %v274_v50 = vadd.s32 127, %v273_v59  ;;  %v291_v14 = vand.u32 3, %v290_v35 }
  0xc2   :  { %v365_v9 = vsub.s32 %v361_v42, %v364_v20  ;;  %v186_v23 = vadd.s32 3, %v182_v12 }
  0xc3   :  { %vm446_vm10 = vcmp.lt.s32.totalorder %v445_v45, 0  ;;  %v272_v52 = vor.u32 %v271_v48, %v270_v47  ;;  %v275_v53 = vshll.u32 %v274_v50, 23  ;;  %vm296_vm0 = vcmp.eq.s32.totalorder %v291_v14, 2 }
  0xc4   :  { %v164_v55 = vsel %vm446_vm10, 0, %v445_v45  ;;  %v367_v4 = vsub.s32 0, %v365_v9  ;;  %v187_v50 = vand.u32 3, %v186_v23  ;;  %vm293_vm1 = vcmp.eq.s32.totalorder %v291_v14, 0 }
  0xc5   :  { %v165_v57 = vsub.s32 32, %v164_v55  ;;  %v169_v17 = vsub.s32 4294967266, %v164_v55  ;;  %v276_v28 = vor.u32 4788187, %v275_v53  ;;  %v166_v61 = vshll.u32 %v157_v33, %v164_v55 }
  0xc6   :  { %v279_v1 = vcvt.s32.f32 %v272_v52  ;;  %v452_v44 = vmin.u32 %v367_v4, %v365_v9  ;;  %v387_v55 = vsub.s32 4, %v764_v51  ;;  %vm292_vm2 = vcmp.lt.s32.totalorder %v291_v14, 2 }
  0xc7   :  { %v167_v62 = vshrl.u32 %v149_v56, %v165_v57  ;;  %v170_v5 = vadd.s32 127, %v169_v17  ;;  %v277_v41 = vand.u32 2147483647, %v276_v28  ;;  %vm192_vm5 = vcmp.eq.s32.totalorder %v187_v50, 2 }
  0xc8   :  { %v369_v15 = vclz %v452_v44  ;;  %vm189_vm7 = vcmp.eq.s32.totalorder %v187_v50, 0  ;;  %vm188_vm8 = vcmp.lt.s32.totalorder %v187_v50, 2 }
  0xc9   :  { %v168_v2 = vor.u32 %v167_v62, %v166_v61  ;;  %v171_v3 = vshll.u32 %v170_v5, 23  ;;  %v280_v6 = vmul.f32 %v279_v1, %v277_v41  ;;  %v413_v61 = vpop.permute.xlu1 %412 }
  0xca   :  { %v453_v58 = vadd.s32 4294967294, %v369_v15 }
  0xcb   :  { %v172_v7 = vor.u32 4788187, %v171_v3  ;;  %v281_v10 = vxor.u32 2147483648, %v280_v6  ;;  %v175_v22 = vcvt.s32.f32 %v168_v2  ;;  %v388_v2 = vsel %vm303_vm3, %v387_v55, %v764_v51 }
  0xcc   :  { %vm454_vm14 = vcmp.lt.s32.totalorder %v453_v58, 0 }
  0xcd   :  { %v173_v13 = vand.u32 2147483647, %v172_v7  ;;  %v282_v18 = vsel %vm199_vm11, %v281_v10, %v280_v6  ;;  %v372_v24 = vsel %vm454_vm14, 0, %v453_v58  ;;  %v390_v6 = vsel %vm804_vm6, 0, %v388_v2  ;;  %v408_v7 = vpop.permute.xlu0 %407 }
  0xce   :  { %v285_v31 = vsel %vm775_vm12, %v586_v39, %v282_v18  ;;  %v373_v25 = vsub.s32 32, %v372_v24  ;;  %v377_v32 = vsub.s32 4294967266, %v372_v24  ;;  %v374_v36 = vshll.u32 %v365_v9, %v372_v24 }
  0xcf   :  { %v176_v60 = vmul.f32 %v175_v22, %v173_v13  ;;  %479 = vcosq.f32 %v285_v31  ;;  %v394_v10 = vadd.s32 3, %v390_v6 }
  0xd0   :  { %481 = vsinq.f32 %v285_v31  ;;  %v375_v40 = vshrl.u32 %v357_v34, %v373_v25  ;;  %v378_v42 = vadd.s32 127, %v377_v32 }
  0xd1   :  { %v177_v8 = vxor.u32 2147483648, %v176_v60  ;;  %v395_v11 = vand.u32 3, %v394_v10  ;;  %v418_v31 = vpop.permute.xlu0 %417 }
  0xd2   :  { %v376_v19 = vor.u32 %v375_v40, %v374_v36  ;;  %v379_v21 = vshll.u32 %v378_v42, 23 }
  0xd3   :  { %v178_v27 = vsel %vm95_vm13, %v177_v8, %v176_v60  ;;  %vm400_vm10 = vcmp.eq.s32.totalorder %v395_v11, 2  ;;  %vm397_vm11 = vcmp.eq.s32.totalorder %v395_v11, 0  ;;  %vm396_vm12 = vcmp.lt.s32.totalorder %v395_v11, 2 }
  0xd4   :  { %v181_v37 = vsel %vm788_vm15, %v580_v30, %v178_v27  ;;  %v380_v16 = vor.u32 4788187, %v379_v21  ;;  %v383_v47 = vcvt.s32.f32 %v376_v19  ;;  %vm393_vm13 = vweird.f32 %v584_v38 }
  0xd5   :  { %483 = vcosq.f32 %v181_v37 }
  0xd6   :  { %485 = vsinq.f32 %v181_v37  ;;  %v381_v46 = vand.u32 2147483647, %v380_v16 }
  0xd8   :  { %v384_v53 = vmul.f32 %v383_v47, %v381_v46 }
  0xd9   :  { %v480_v26 = vpop.eup %479 }
  0xda   :  { %v482_v59 = vpop.eup %481  ;;  %v297_v45 = vxor.u32 2147483648, %v480_v26  ;;  %v385_v20 = vxor.u32 2147483648, %v384_v53 }
  0xdb   :  { %v294_v48 = vxor.u32 2147483648, %v482_v59 }
  0xdc   :  { %v298_v52 = vsel %vm296_vm0, %v297_v45, %v482_v59  ;;  %v386_v63 = vsel %vm303_vm3, %v385_v20, %v384_v53 }
  0xdd   :  { %v295_v56 = vsel %vm293_vm1, %v480_v26, %v294_v48  ;;  %v389_v3 = vsel %vm804_vm6, %v584_v38, %v386_v63 }
  0xde   :  { %v299_v17 = vsel %vm292_vm2, %v295_v56, %v298_v52  ;;  %487 = vcosq.f32 %v389_v3 }
  0xdf   :  { %v484_v57 = vpop.eup %483  ;;  %v300_v62 = vsel %vm289_vm4, nan, %v299_v17  ;;  %489 = vsinq.f32 %v389_v3 }
  0xe0   :  { %v486_v28 = vpop.eup %485  ;;  %v193_v5 = vxor.u32 2147483648, %v484_v57  ;;  %v421_v41 = vmul.f32 %v413_v61, %v300_v62 }
  0xe1   :  { %v190_v1 = vxor.u32 2147483648, %v486_v28 }
  0xe2   :  { %v194_v39 = vsel %vm192_vm5, %v193_v5, %v486_v28  ;;  %425 = vst [vmem:[#allocation2 + $0xb] sm:$0xff] %v421_v41 }
  0xe3   :  { %v191_v4 = vsel %vm189_vm7, %v484_v57, %v190_v1 }
  0xe4   :  { %v195_v49 = vsel %vm188_vm8, %v191_v4, %v194_v39 }
  0xe5   :  { %v196_v44 = vsel %vm185_vm9, nan, %v195_v49 }
  0xe6   :  { %v420_v51 = vmul.f32 %v408_v7, %v196_v44 }
  0xe8   :  { %424 = vst [vmem:[#allocation2 + $0x3] sm:$0xff] %v420_v51  ;;  %v488_v13 = vpop.eup %487 }
  0xe9   :  { %v490_v22 = vpop.eup %489  ;;  %v401_v54 = vxor.u32 2147483648, %v488_v13 }
  0xea   :  { %v398_v15 = vxor.u32 2147483648, %v490_v22 }
  0xeb   :  { %v402_v29 = vsel %vm400_vm10, %v401_v54, %v490_v22 }
  0xec   :  { %v399_v30 = vsel %vm397_vm11, %v488_v13, %v398_v15 }
  0xed   :  { %v403_v18 = vsel %vm396_vm12, %v399_v30, %v402_v29 }
  0xee   :  { %v404_v60 = vsel %vm393_vm13, nan, %v403_v18 }
  0xef   :  { %v422_v58 = vmul.f32 %v418_v31, %v404_v60 }
  0xf1   :  { %426 = vst [vmem:[#allocation2 + $0x13] sm:$0xff] %v422_v58 }
  0xf2   :  { %502 = shalt.err (!%p499_p4)
}
  0xf3   :  { %s503_s10 = scalar_lea.hbm %s832_s4, 512 }
  0xf4   :  { %p504_p5 = scmp.ne.s32.totalorder %s832_s4, %s503_s10  ;;  %p507_p6 = scmp.lt.u32.totalorder %s503_s10, %s832_s4 }
  0xf6   :  { %p509_p7 = pnand %p507_p6, %p504_p5 }
  0xf8   :  { %512 = shalt.err (!%p509_p7)
}
  0xf9   :  { %s523_s15 = smov 128   ;;  %s524_s16 = smov 8  }
  0xfa   :  { %438 = dma.vmem_to_hbm [thread:$0]  %s433_s2, 512, %s832_s4, [#allocation3], %s523_s15, %s523_s15, %s524_s16  }
  0xfb   :  { %513 = dma.done.wait [#allocation3], 512  }
  0xfc   :  { %514 = vsyncadd [#allocation3], 4294966784 }
  0xfd   :  { %442 = vsyncpa [#allocation3], 1 }

</bundles_post_ra>
